<compile_context>
chip_gen: v6e
topology: v6e:2x2x1
jax: 0.10.0
libtpu: 0.0.40
codegen_flags: <defaults>
</compile_context>

<pallas_src>
import functools

import jax
import jax.numpy as jnp
from jax.experimental import pallas as pl
from jax.experimental.pallas import tpu as pltpu


def _round_up(x: int, m: int) -> int:
    return (x + m - 1) // m * m


def _smoothing_loss_kernel(disp_ref, img_ref, out_ref, *, h, w, inv_cx, inv_cy):
    # disp_ref: (Cd, Hp, Wp), img_ref: (C, Hp, Wp), out_ref: (8, Wp)
    d = disp_ref[...].astype(jnp.float32)
    im = img_ref[...].astype(jnp.float32)
    _, hp, wp = d.shape

    # Full-shape neighbour diffs: roll by (size - 1) == roll by -1, so
    # position j holds x[j] - x[j+1] (wraparound / pad columns masked below).
    dx = jnp.abs(d - pltpu.roll(d, wp - 1, axis=2))                    # (Cd, Hp, Wp)
    dy = jnp.abs(d - pltpu.roll(d, hp - 1, axis=1))                    # (Cd, Hp, Wp)
    gix = jnp.mean(jnp.abs(im - pltpu.roll(im, wp - 1, axis=2)), axis=0)  # (Hp, Wp)
    giy = jnp.mean(jnp.abs(im - pltpu.roll(im, hp - 1, axis=1)), axis=0)  # (Hp, Wp)

    row = jax.lax.broadcasted_iota(jnp.int32, (hp, wp), 0)
    col = jax.lax.broadcasted_iota(jnp.int32, (hp, wp), 1)
    mask_x = (row < h) & (col < (w - 1))
    mask_y = (row < (h - 1)) & (col < w)

    # Edge-aware weighting; invalid (pad / wraparound) positions zeroed.
    term_x = jnp.where(mask_x[None], dx * jnp.exp(-gix)[None], 0.0)    # (Cd, Hp, Wp)
    term_y = jnp.where(mask_y[None], dy * jnp.exp(-giy)[None], 0.0)    # (Cd, Hp, Wp)

    # Reduce channels + rows, keep the lane axis; normalize with compile-time
    # reciprocals (global means over the whole batch).
    sx = jnp.sum(jnp.sum(term_x, axis=0), axis=0, keepdims=True)       # (1, Wp)
    sy = jnp.sum(jnp.sum(term_y, axis=0), axis=0, keepdims=True)       # (1, Wp)
    combined = sx * inv_cx + sy * inv_cy                               # (1, Wp)

    # Lane-dense output block: partial sums in sublane 0, zeros elsewhere.
    out_row = jax.lax.broadcasted_iota(jnp.int32, (8, wp), 0)
    out_ref[...] = jnp.where(out_row == 0, combined, 0.0)


def smoothing_loss(disp: jax.Array, img: jax.Array) -> jax.Array:
    """disp: (N, Cd, H, W), img: (N, C, H, W) -> scalar f32 loss."""
    n, cd, h, w = disp.shape
    ni, c, hi, wi = img.shape
    assert n == ni and (h, w) == (hi, wi), "disp / img spatial shapes must match"
    assert h >= 2 and w >= 2, "need at least 2 rows and 2 cols for gradients"

    # Pad to lane/sublane-aligned spatial dims (masked inside the kernel).
    hp = _round_up(h, 8)
    wp = _round_up(w, 128)
    if (hp, wp) != (h, w):
        pad = ((0, 0), (0, 0), (0, hp - h), (0, wp - w))
        disp_p = jnp.pad(disp, pad)
        img_p = jnp.pad(img, pad)
    else:
        disp_p, img_p = disp, img

    # Normalization constants as Python floats (hoisted out of the kernel).
    inv_cx = 1.0 / float(n * cd * h * (w - 1))
    inv_cy = 1.0 / float(n * cd * (h - 1) * w)

    kernel = functools.partial(
        _smoothing_loss_kernel, h=h, w=w, inv_cx=inv_cx, inv_cy=inv_cy)

    partials = pl.pallas_call(
        kernel,
        out_shape=jax.ShapeDtypeStruct((n, 8, wp), jnp.float32),
        grid=(n,),
        in_specs=[
            pl.BlockSpec((pl.Squeezed(), cd, hp, wp), lambda b: (b, 0, 0, 0)),
            pl.BlockSpec((pl.Squeezed(), c, hp, wp), lambda b: (b, 0, 0, 0)),
        ],
        out_specs=pl.BlockSpec((pl.Squeezed(), 8, wp), lambda b: (b, 0, 0)),
        compiler_params=pltpu.CompilerParams(
            dimension_semantics=("parallel",),
            vmem_limit_bytes=32 * 1024 * 1024,
        ),
    )(disp_p, img_p)

    # Final (tiny) reduction of the per-batch lane-dense partial sums.
    return jnp.sum(partials)


def _smoothing_loss_ref(disp, img):
    # Pure-JAX reference mirroring the PyTorch forward exactly.
    gdx = jnp.abs(disp[:, :, :, :-1] - disp[:, :, :, 1:])
    gdy = jnp.abs(disp[:, :, :-1, :] - disp[:, :, 1:, :])
    gix = jnp.mean(jnp.abs(img[:, :, :, :-1] - img[:, :, :, 1:]), 1, keepdims=True)
    giy = jnp.mean(jnp.abs(img[:, :, :-1, :] - img[:, :, 1:, :]), 1, keepdims=True)
    return (gdx * jnp.exp(-gix)).mean() + (gdy * jnp.exp(-giy)).mean()


if __name__ == "__main__":
    key = jax.random.PRNGKey(0)
    k_disp, k_img = jax.random.split(key)

    # Typical usage: single-channel disparity, 3-channel RGB image.
    disp = jax.random.uniform(k_disp, (2, 1, 16, 16), dtype=jnp.float32)
    img = jax.random.uniform(k_img, (2, 3, 16, 16), dtype=jnp.float32)

    loss = smoothing_loss(disp, img)
    jax.block_until_ready(loss)

    ref = _smoothing_loss_ref(disp, img)
    assert jnp.allclose(loss, ref, rtol=1e-5, atol=1e-5), (loss, ref)

    print("KERNEL_OK")
</pallas_src>

<mosaic_0001>
module attributes {stable_mosaic.version = 11 : i64} {
  func.func @_smoothing_loss_kernel(%arg0: i32, %arg1: memref<1x1x16x128xf32, #tpu.memory_space<vmem>>, %arg2: memref<1x3x16x128xf32, #tpu.memory_space<vmem>>, %arg3: memref<1x8x128xf32, #tpu.memory_space<vmem>>) attributes {dimension_semantics = [#tpu.dimension_semantics<parallel>], iteration_bounds = array<i64: 2>, scalar_prefetch = 0 : i64, scratch_operands = 0 : i64, tpu.core_type = #tpu.core_type<tc>, window_params = [{transform_indices = @transform_0, window_bounds = array<i64: 1, 1, 16, 128>}, {transform_indices = @transform_1, window_bounds = array<i64: 1, 3, 16, 128>}, {transform_indices = @transform_2, window_bounds = array<i64: 1, 8, 128>}]} {
    %c0 = arith.constant 0 : index
    %c0_0 = arith.constant 0 : index
    %c0_1 = arith.constant 0 : index
    %c0_2 = arith.constant 0 : index
    %0 = vector.load %arg1[%c0, %c0_0, %c0_1, %c0_2] : memref<1x1x16x128xf32, #tpu.memory_space<vmem>>, vector<1x1x16x128xf32>
    %1 = vector.shape_cast %0 : vector<1x1x16x128xf32> to vector<1x16x128xf32>
    %c0_3 = arith.constant 0 : index
    %c0_4 = arith.constant 0 : index
    %c0_5 = arith.constant 0 : index
    %c0_6 = arith.constant 0 : index
    %2 = vector.load %arg2[%c0_3, %c0_4, %c0_5, %c0_6] : memref<1x3x16x128xf32, #tpu.memory_space<vmem>>, vector<1x3x16x128xf32>
    %3 = vector.shape_cast %2 : vector<1x3x16x128xf32> to vector<3x16x128xf32>
    %c127_i32 = arith.constant 127 : i32
    %4 = tpu.dynamic_rotate %1 by %c127_i32 dim 2 : vector<1x16x128xf32>, i32 -> vector<1x16x128xf32>
    %5 = arith.subf %1, %4 : vector<1x16x128xf32>
    %6 = math.absf %5 : vector<1x16x128xf32>
    %c15_i32 = arith.constant 15 : i32
    %7 = tpu.dynamic_rotate %1 by %c15_i32 dim 1 : vector<1x16x128xf32>, i32 -> vector<1x16x128xf32>
    %8 = arith.subf %1, %7 : vector<1x16x128xf32>
    %9 = math.absf %8 : vector<1x16x128xf32>
    %c127_i32_7 = arith.constant 127 : i32
    %10 = tpu.dynamic_rotate %3 by %c127_i32_7 dim 2 : vector<3x16x128xf32>, i32 -> vector<3x16x128xf32>
    %11 = arith.subf %3, %10 : vector<3x16x128xf32>
    %12 = math.absf %11 : vector<3x16x128xf32>
    %cst = arith.constant dense<0.000000e+00> : vector<16x128xf32>
    %13 = vector.multi_reduction <add>, %12, %cst [0] : vector<3x16x128xf32> to vector<16x128xf32>
    %cst_8 = arith.constant 3.000000e+00 : f32
    %14 = vector.broadcast %cst_8 : f32 to vector<16x128xf32>
    %15 = arith.divf %13, %14 : vector<16x128xf32>
    %c15_i32_9 = arith.constant 15 : i32
    %16 = tpu.dynamic_rotate %3 by %c15_i32_9 dim 1 : vector<3x16x128xf32>, i32 -> vector<3x16x128xf32>
    %17 = arith.subf %3, %16 : vector<3x16x128xf32>
    %18 = math.absf %17 : vector<3x16x128xf32>
    %cst_10 = arith.constant dense<0.000000e+00> : vector<16x128xf32>
    %19 = vector.multi_reduction <add>, %18, %cst_10 [0] : vector<3x16x128xf32> to vector<16x128xf32>
    %cst_11 = arith.constant 3.000000e+00 : f32
    %20 = vector.broadcast %cst_11 : f32 to vector<16x128xf32>
    %21 = arith.divf %19, %20 : vector<16x128xf32>
    %22 = tpu.iota {dimensions = array<i32: 0>} : vector<16x128xi32>
    %23 = tpu.iota {dimensions = array<i32: 1>} : vector<16x128xi32>
    %c16_i32 = arith.constant 16 : i32
    %24 = vector.broadcast %c16_i32 : i32 to vector<16x128xi32>
    %25 = arith.cmpi slt, %22, %24 : vector<16x128xi32>
    %c15_i32_12 = arith.constant 15 : i32
    %26 = vector.broadcast %c15_i32_12 : i32 to vector<16x128xi32>
    %27 = arith.cmpi slt, %23, %26 : vector<16x128xi32>
    %28 = arith.andi %25, %27 : vector<16x128xi1>
    %c15_i32_13 = arith.constant 15 : i32
    %29 = vector.broadcast %c15_i32_13 : i32 to vector<16x128xi32>
    %30 = arith.cmpi slt, %22, %29 : vector<16x128xi32>
    %c16_i32_14 = arith.constant 16 : i32
    %31 = vector.broadcast %c16_i32_14 : i32 to vector<16x128xi32>
    %32 = arith.cmpi slt, %23, %31 : vector<16x128xi32>
    %33 = arith.andi %30, %32 : vector<16x128xi1>
    %34 = vector.shape_cast %28 : vector<16x128xi1> to vector<1x16x128xi1>
    %cst_15 = arith.constant 0.000000e+00 : f32
    %35 = vector.broadcast %cst_15 : f32 to vector<16x128xf32>
    %36 = arith.subf %35, %15 : vector<16x128xf32>
    %37 = math.exp %36 : vector<16x128xf32>
    %38 = vector.shape_cast %37 : vector<16x128xf32> to vector<1x16x128xf32>
    %39 = arith.mulf %6, %38 : vector<1x16x128xf32>
    %cst_16 = arith.constant 0.000000e+00 : f32
    %40 = vector.broadcast %cst_16 : f32 to vector<1x16x128xf32>
    %41 = arith.select %34, %39, %40 : vector<1x16x128xi1>, vector<1x16x128xf32>
    %42 = vector.shape_cast %33 : vector<16x128xi1> to vector<1x16x128xi1>
    %cst_17 = arith.constant 0.000000e+00 : f32
    %43 = vector.broadcast %cst_17 : f32 to vector<16x128xf32>
    %44 = arith.subf %43, %21 : vector<16x128xf32>
    %45 = math.exp %44 : vector<16x128xf32>
    %46 = vector.shape_cast %45 : vector<16x128xf32> to vector<1x16x128xf32>
    %47 = arith.mulf %9, %46 : vector<1x16x128xf32>
    %cst_18 = arith.constant 0.000000e+00 : f32
    %48 = vector.broadcast %cst_18 : f32 to vector<1x16x128xf32>
    %49 = arith.select %42, %47, %48 : vector<1x16x128xi1>, vector<1x16x128xf32>
    %cst_19 = arith.constant dense<0.000000e+00> : vector<16x128xf32>
    %50 = vector.multi_reduction <add>, %41, %cst_19 [0] : vector<1x16x128xf32> to vector<16x128xf32>
    %cst_20 = arith.constant dense<0.000000e+00> : vector<128xf32>
    %51 = vector.multi_reduction <add>, %50, %cst_20 [0] : vector<16x128xf32> to vector<128xf32>
    %52 = vector.shape_cast %51 : vector<128xf32> to vector<1x128xf32>
    %cst_21 = arith.constant dense<0.000000e+00> : vector<16x128xf32>
    %53 = vector.multi_reduction <add>, %49, %cst_21 [0] : vector<1x16x128xf32> to vector<16x128xf32>
    %cst_22 = arith.constant dense<0.000000e+00> : vector<128xf32>
    %54 = vector.multi_reduction <add>, %53, %cst_22 [0] : vector<16x128xf32> to vector<128xf32>
    %55 = vector.shape_cast %54 : vector<128xf32> to vector<1x128xf32>
    %cst_23 = arith.constant 0.00208333344 : f32
    %56 = vector.broadcast %cst_23 : f32 to vector<1x128xf32>
    %57 = arith.mulf %52, %56 : vector<1x128xf32>
    %cst_24 = arith.constant 0.00208333344 : f32
    %58 = vector.broadcast %cst_24 : f32 to vector<1x128xf32>
    %59 = arith.mulf %55, %58 : vector<1x128xf32>
    %60 = arith.addf %57, %59 : vector<1x128xf32>
    %61 = tpu.iota {dimensions = array<i32: 0>} : vector<8x128xi32>
    %c0_i32 = arith.constant 0 : i32
    %62 = vector.broadcast %c0_i32 : i32 to vector<8x128xi32>
    %63 = arith.cmpi eq, %61, %62 : vector<8x128xi32>
    %cst_25 = arith.constant 0.000000e+00 : f32
    %64 = vector.shape_cast %60 : vector<1x128xf32> to vector<1x128xf32>
    %65 = vector.broadcast %64 : vector<1x128xf32> to vector<8x128xf32>
    %66 = vector.broadcast %cst_25 : f32 to vector<8x128xf32>
    %67 = arith.select %63, %65, %66 : vector<8x128xi1>, vector<8x128xf32>
    %c0_26 = arith.constant 0 : index
    %c0_27 = arith.constant 0 : index
    %c0_28 = arith.constant 0 : index
    %68 = vector.load %arg3[%c0_26, %c0_27, %c0_28] : memref<1x8x128xf32, #tpu.memory_space<vmem>>, vector<1x8x128xf32>
    %69 = vector.shape_cast %68 : vector<1x8x128xf32> to vector<8x128xf32>
    %70 = vector.shape_cast %67 : vector<8x128xf32> to vector<1x8x128xf32>
    tpu.vector_store %arg3[%c0_26, %c0_27, %c0_28], %70 {strides = array<i32>} : memref<1x8x128xf32, #tpu.memory_space<vmem>>, vector<1x8x128xf32>,
    return
  }
  func.func @transform_0(%arg0: i32) -> (i32, i32, i32, i32) {
    %c0_i32 = arith.constant 0 : i32
    %c0_i32_0 = arith.constant 0 : i32
    %c0_i32_1 = arith.constant 0 : i32
    %c0_i32_2 = arith.constant 0 : i32
    return %arg0, %c0_i32, %c0_i32_0, %c0_i32_1 : i32, i32, i32, i32
  }
  func.func @transform_1(%arg0: i32) -> (i32, i32, i32, i32) {
    %c0_i32 = arith.constant 0 : i32
    %c0_i32_0 = arith.constant 0 : i32
    %c0_i32_1 = arith.constant 0 : i32
    %c0_i32_2 = arith.constant 0 : i32
    return %arg0, %c0_i32, %c0_i32_0, %c0_i32_1 : i32, i32, i32, i32
  }
  func.func @transform_2(%arg0: i32) -> (i32, i32, i32) {
    %c0_i32 = arith.constant 0 : i32
    %c0_i32_0 = arith.constant 0 : i32
    %c0_i32_1 = arith.constant 0 : i32
    return %arg0, %c0_i32, %c0_i32_0 : i32, i32, i32
  }
}

</mosaic_0001>

<bundles_post_ra>
// kernel: tpu_custom_call.1
= control target key start
LH: loop header
LB: loop body
LE: loop exit
PB: predicated region body
PF: predicated region fallthrough
CT: control target
= control target key end

     0   :  { %7 = vsyncpa [#allocation3], 0  ;;  %s956_s0 = inlined_call_operand.hbm [shape: f32[2,1,16,128], index: 0, kind: input, shape index: {}]   ;;  %s957_s1 = inlined_call_operand.hbm [shape: f32[2,3,16,128], index: 1, kind: input, shape index: {}]   ;;  %s958_s2 = inlined_call_operand.hbm [shape: f32[2,8,128], index: 2, kind: output, shape index: {}]  }
   0x1   :  { %9 = vsyncpa [#allocation3 + $0x1], 0 }
   0x2   :  { %10 = vsyncpa [#allocation6], 0 }
   0x3   :  { %12 = vsyncpa [#allocation6 + $0x1], 0 }
   0x4   :  { %13 = vsyncpa [#allocation4], 0 }
   0x5   :  { %15 = vsyncpa [#allocation4 + $0x1], 0  ;;  %s681_s9 = smov 0   ;;  %s683_s10 = smov 0  }
   0x6   :  { %s685_s11 = smov 0   ;;  %s687_s12 = smov 0  }
   0x7 LB: > { %s702_s13 = sadd.s32 4294967295, %s658_s12   ;;  %s454_s14 = sadd.s32 4294967294, %s658_s12   ;;  %s658_s12 = sphi %s687_s12, %s974_s12   ;;  %s654_s11 = sphi %s685_s11, %s973_s11   ;;  %s650_s10 = sphi %s683_s10, %s972_s10   ;;  %s646_s9 = sphi %s681_s9, %s971_s9  }
   0x8   : > { %s706_s15 = sadd.s32 1, %s658_s12   ;;  %s28_s16 = sadd.s32 1, %s654_s11 }
   0x9   : > { %s25_s17 = ssub.s32 %s658_s12, %s706_s15  ;;  %p35_p0 = scmp.ne.s32.totalorder %s654_s11, %s650_s10 }
   0xa   : > { %p26_p1 = scmp.eq.s32.totalorder %s25_s17, 0  ;;  %p36_p2 = scmp.eq.s32.totalorder %s658_s12, 0 }
   0xb   : > { %p41_p3 = scmp.ne.s32.totalorder %s650_s10, %s646_s9  ;;  %p42_p4 = scmp.eq.s32.totalorder %s702_s13, 0 }
   0xc   : > { %s718_s18 = scalar_select %p26_p1, %s654_s11, %s28_s16  }
   0xd   : > { %p720_p5 = por %p36_p2, %p35_p0  ;;  %p724_p6 = por %p42_p4, %p41_p3 }
   0xe   : > { %p91_p7 = scmp.eq.s32.totalorder %s702_s13, 1  ;;  %p97_p8 = scmp.eq.s32.totalorder %s454_s14, 1 }
   0xf   : > { %s962_s20 = scalar_select %p724_p6, 1, 0 }
  0x10   : > { %p489_p10 = scmp.lt.s32.totalorder %s658_s12, 2  ;;  %p731_p11 = por %p91_p7, %p35_p0 }
  0x11   : > { %p735_p12 = por %p97_p8, %p41_p3  ;;  %s740_s23 = sand.u32 1, %s654_s11  }
  0x12   : > { %s963_s21 = scalar_select %p731_p11, 1, 0 }
  0x13   : > { %s964_s22 = scalar_select %p735_p12, 1, 0 }
  0x14   : > { %s468_s24 = sshll.u32 %s658_s12, 8  ;;  %s457_s25 = sshll.u32 %s740_s23, 4 }
  0x15   : > { %s747_s28 = scalar_lea.hbm %s956_s0, %s468_s24  ;;  %s121_s29 = scalar_lea.vmem [#allocation2], %s457_s25 }
  0x16   : > { %s128_s30 = sshll.u32 %s121_s29, 4  ;;  %p751_p13 = pnand %p489_p10, %p720_p5  ;;  %s755_s30 = int_to_ptr.vmem [resolvable:$true] %s128_s30 }
  0x17   : > { %s118_s4 = scalar_lea.sflag [#allocation3], %s740_s23  ;;  %s534_s5 = scalar_lea.hbm %s747_s28, 256 }
  0x18   : > { %p535_p0 = scmp.ne.s32.totalorder %s747_s28, %s534_s5  ;;  %p536_p1 = pneg %p751_p13 }
  0x19   : > { %s539_s8 = scalar_lea.hbm %s956_s0, 512  ;;  %p540_p4 = scmp.lt.s32.totalorder %s747_s28, %s956_s0 }
  0x1a   : > { %p537_p2 = pnand %p536_p1, %p535_p0  ;;  %p541_p5 = scmp.lt.s32.totalorder %s539_s8, %s534_s5 }
  0x1c   : > { %p538_p3 = pneg %p537_p2  ;;  %p542_p7 = por %p541_p5, %p540_p4 }
  0x1e   : > { %p543_p8 = pnand %p542_p7, %p538_p3 }
  0x20   : > { %546 = shalt.err (!%p543_p8)
}
  0x21   : > { %s547_s17 = scalar_lea.vmem %s755_s30, 256  ;;  %s660_s19 = smov [#allocation2]  }
  0x22   : > { %p548_p10 = scmp.ne.s32.totalorder %s755_s30, %s547_s17  ;;  %s552_s24 = sshll.u32 %s660_s19, 4  ;;  %s553_s24 = int_to_ptr.vmem [resolvable:$false] %s552_s24 }
  0x23   : > { %s554_s25 = scalar_lea.vmem %s553_s24, 512  ;;  %p555_p9 = scmp.lt.s32.totalorder %s755_s30, %s553_s24 }
  0x24   : > { %p550_p0 = pnand %p548_p10, %p536_p1  ;;  %p556_p12 = scmp.lt.s32.totalorder %s554_s25, %s547_s17 }
  0x26   : > { %p551_p2 = pneg %p550_p0  ;;  %p557_p11 = por %p556_p12, %p555_p9 }
  0x28   : > { %p558_p4 = pnand %p557_p11, %p551_p2 }
  0x2a   : > { %561 = shalt.err (!%p558_p4)
}
  0x2b   : > { %s661_s26 = smov 128   ;;  %s662_s27 = smov 8  }
  0x2c   : > { %481 = dma.hbm_to_vmem [thread:$0]  (!%p751_p13), %s747_s28, 256, %s755_s30, %s118_s4, %s661_s26, %s661_s26, %s662_s27  }
  0x2d   : > { %p461_p9 = scmp.ge.s32.totalorder %s658_s12, 1  ;;  %p157_p11 = scmp.lt.s32.totalorder %s658_s12, 3 }
  0x2e   : > { %s469_s29 = smul.u32 48, %s740_s23  ;;  %s139_s28 = scalar_lea.sflag [#allocation6], %s740_s23 }
  0x2f   : > { %p790_p12 = pnand %p461_p9, %p157_p11  ;;  %s470_s6 = smul.u32 768, %s658_s12 }
  0x30   : > { %s142_s16 = scalar_lea.vmem [#allocation5], %s469_s29  ;;  %s567_s24 = scalar_lea.hbm %s957_s1, 1536 }
  0x31   : > { %s798_s14 = scalar_lea.hbm %s957_s1, %s470_s6  ;;  %s149_s17 = sshll.u32 %s142_s16, 4  ;;  %s800_s17 = int_to_ptr.vmem [resolvable:$true] %s149_s17 }
  0x32   : > { %s562_s30 = scalar_lea.hbm %s798_s14, 768  ;;  %p568_p8 = scmp.lt.s32.totalorder %s798_s14, %s957_s1 }
  0x33   : > { %p563_p3 = scmp.ne.s32.totalorder %s798_s14, %s562_s30  ;;  %p569_p10 = scmp.lt.s32.totalorder %s567_s24, %s562_s30 }
  0x35   : > { %p565_p5 = pnand %p563_p3, %p536_p1  ;;  %p570_p0 = por %p569_p10, %p568_p8 }
  0x37   : > { %p566_p7 = pneg %p565_p5 }
  0x39   : > { %p571_p2 = pnand %p570_p0, %p566_p7 }
  0x3b   : > { %574 = shalt.err (!%p571_p2)
}
  0x3c   : > { %s575_s23 = scalar_lea.vmem %s800_s17, 768  ;;  %s663_s29 = smov [#allocation5]  }
  0x3d   : > { %p576_p4 = scmp.ne.s32.totalorder %s800_s17, %s575_s23  ;;  %s580_s7 = sshll.u32 %s663_s29, 4  ;;  %s581_s7 = int_to_ptr.vmem [resolvable:$false] %s580_s7 }
  0x3e   : > { %s582_s8 = scalar_lea.vmem %s581_s7, 1536  ;;  %p583_p3 = scmp.lt.s32.totalorder %s800_s17, %s581_s7 }
  0x3f   : > { %p578_p9 = pnand %p576_p4, %p536_p1  ;;  %p584_p5 = scmp.lt.s32.totalorder %s582_s8, %s575_s23 }
  0x41   : > { %p579_p11 = pneg %p578_p9  ;;  %p585_p6 = por %p584_p5, %p583_p3 }
  0x43   : > { %p586_p8 = pnand %p585_p6, %p579_p11 }
  0x45   : > { %589 = shalt.err (!%p586_p8)
}
  0x46   : > { %484 = dma.hbm_to_vmem [thread:$0]  (!%p751_p13), %s798_s14, 768, %s800_s17, %s139_s28, %s661_s26, %s661_s26, %s662_s27  }
  0x47   : > { %161 = sbr.rel (%p790_p12) target bundleno = 267 (0x10b), region = 28  ;;  %s831_s16 = sand.u32 (!%p790_p12), 1, %s650_s10  }
  0x48   : > { %s462_s30 = sshll.u32 (!%p790_p12), %s831_s16, 4  ;;  %s164_s4 = scalar_lea.sflag (!%p790_p12), [#allocation3], %s831_s16 }
  0x49   : > { %s167_s19 = scalar_lea.vmem (!%p790_p12), [#allocation2], %s462_s30  ;;  %p967_p6 = scmp.ne.s32.totalorder (!%p790_p12), %s962_s20, 0 }
  0x4c   : > { %633 = dma.done.wait (%p967_p6), %s164_s4, 256  }
  0x4d   : > { %635 = vsyncadd (%p967_p6), %s164_s4, 4294967040  ;;  %s471_s3 = smul.u32 48, %s831_s16  ;;  %s173_s26 = scalar_lea.sflag [#allocation6], %s831_s16 }
  0x4f   : > { %s176_s27 = scalar_lea.vmem [#allocation5], %s471_s3 }
  0x50   : > { %637 = dma.done.wait (%p967_p6), %s173_s26, 768  }
  0x51   : > { %639 = vsyncadd (%p967_p6), %s173_s26, 4294966528  ;;  %v845_v0 = vld [vmem:[%s176_s27 + $0x10] sm:$0xff]  ;;  %v847_v1 = vld [vmem:[%s176_s27] sm:$0xff]  ;;  %s664_s5 = smov 127   ;;  %v220_v8 = vlaneseq  ;;  %s463_s20 = sshll.u32 %s831_s16, 3 }
  0x52   : > { %233 = vrot.lane.b32.xlu1 %v845_v0, %s664_s5  ;;  %229 = vrot.lane.b32.xlu0 %v847_v1, %s664_s5  ;;  %v851_v2 = vld [vmem:[%s176_s27 + $0x18] sm:$0xff]  ;;  %v853_v3 = vld [vmem:[%s176_s27 + $0x8] sm:$0xff]  ;;  %v261_v10 = vrot.slane %v845_v0, 1  ;;  %v260_v11 = vrot.slane %v847_v1, 1  ;;  %s465_s14 = sshll.u32 %s702_s13, 7  ;;  %s201_s17 = scalar_lea.vmem [#allocation7], %s463_s20 }
  0x53   : > { %v857_v4 = vld [vmem:[%s176_s27 + $0x28] sm:$0xff]  ;;  %v859_v5 = vld [vmem:[%s176_s27 + $0x20] sm:$0xff]  ;;  %v869_v9 = vshrl.u32 %v220_v8, 7  ;;  %v264_v12 = vrot.slane %v851_v2, 1  ;;  %v263_v13 = vrot.slane %v853_v3, 1  ;;  %s361_s28 = sshll.u32 %s201_s17, 4  ;;  %s919_s6 = scalar_lea.hbm %s958_s2, %s465_s14  ;;  %s362_s28 = int_to_ptr.vmem [resolvable:$true] %s361_s28 }
  0x54   : > { %v863_v6 = vld [vmem:[%s167_s19 + $0x8] sm:$0xff]  ;;  %v865_v7 = vld [vmem:[%s167_s19] sm:$0xff]  ;;  %v265_v16 = vrot.slane %v857_v4, 1  ;;  %v262_v17 = vrot.slane %v859_v5, 1  ;;  %s348_s23 = scalar_lea.sflag [#allocation4], %s831_s16  ;;  %s590_s29 = scalar_lea.vmem %s362_s28, 128 }
  0x55   : > { %vm222_vm0 = vcmp.lt.s32.totalorder %v869_v9, 7  ;;  %v219_v46 = vrot.slane %v863_v6, 1  ;;  %v218_v47 = vrot.slane %v865_v7, 1  ;;  %vm344_vm5 = vcmp.eq.s32.totalorder %v869_v9, 0  ;;  %p591_p13 = scmp.ne.s32.totalorder %s362_s28, %s590_s29  ;;  %p968_p1 = scmp.ne.s32.totalorder %s963_s21, 0 }
  0x56   : > { %235 = vrot.lane.b32.xlu1 %v851_v2, %s664_s5  ;;  %231 = vrot.lane.b32.xlu0 %v853_v3, %s664_s5  ;;  %v267_v14 = vsel %vm222_vm0, %v261_v10, %v264_v12  ;;  %v266_v15 = vsel %vm222_vm0, %v260_v11, %v263_v13  ;;  %v270_v18 = vsel %vm222_vm0, %v264_v12, %v261_v10  ;;  %v290_v10 = vadd.s32 8, %v869_v9  ;;  %s665_s13 = smov [#allocation7]  }
  0x57   : > { %v269_v19 = vsel %vm222_vm0, %v263_v13, %v260_v11  ;;  %v274_v20 = vsub.f32 %v845_v0, %v267_v14  ;;  %v272_v21 = vsub.f32 %v847_v1, %v266_v15  ;;  %v275_v22 = vsub.f32 %v851_v2, %v270_v18  ;;  %p592_p12 = pnand %p591_p13, %p968_p1  ;;  %s594_s7 = sshll.u32 %s665_s13, 4  ;;  %s595_s7 = int_to_ptr.vmem [resolvable:$false] %s594_s7 }
  0x58   : > { %v273_v23 = vsub.f32 %v853_v3, %v269_v19  ;;  %v268_v24 = vsel %vm222_vm0, %v262_v17, %v265_v16  ;;  %v271_v25 = vsel %vm222_vm0, %v265_v16, %v262_v17  ;;  %v223_v52 = vsel %vm222_vm0, %v218_v47, %v219_v46  ;;  %s596_s8 = scalar_lea.vmem %s595_s7, 256  ;;  %p597_p10 = scmp.lt.s32.totalorder %s362_s28, %s595_s7 }
  0x59   : > { %v280_v26 = vand.u32 2147483647, %v274_v20  ;;  %v278_v27 = vand.u32 2147483647, %v272_v21  ;;  %v276_v28 = vsub.f32 %v859_v5, %v268_v24  ;;  %v281_v29 = vand.u32 2147483647, %v275_v22  ;;  %p593_p7 = pneg %p592_p12  ;;  %p598_p0 = scmp.lt.s32.totalorder %s596_s8, %s590_s29 }
  0x5a   : > { %239 = vrot.lane.b32.xlu1 %v857_v4, %s664_s5  ;;  %237 = vrot.lane.b32.xlu0 %v859_v5, %s664_s5  ;;  %v279_v30 = vand.u32 2147483647, %v273_v23  ;;  %v277_v31 = vsub.f32 %v857_v4, %v271_v25  ;;  %v224_v53 = vsel %vm222_vm0, %v219_v46, %v218_v47  ;;  %v225_v60 = vsub.f32 %v865_v7, %v223_v52 }
  0x5b   : > { %v282_v32 = vand.u32 2147483647, %v276_v28  ;;  %v284_v33 = vadd.f32 %v280_v26, %v278_v27  ;;  %v226_v61 = vsub.f32 %v863_v6, %v224_v53  ;;  %v292_v11 = vand.u32 127, %v220_v8  ;;  %p599_p2 = por %p598_p0, %p597_p10 }
  0x5c   : > { %v286_v34 = vadd.f32 %v281_v29, %v279_v30  ;;  %v283_v35 = vand.u32 2147483647, %v277_v31  ;;  %v227_v15 = vand.u32 2147483647, %v225_v60  ;;  %vm299_vm1 = vcmp.lt.s32.totalorder %v290_v10, 15 }
  0x5d   : > { %v285_v36 = vadd.f32 %v284_v33, %v282_v32  ;;  %v228_v16 = vand.u32 2147483647, %v226_v61  ;;  %vm300_vm2 = vcmp.lt.s32.totalorder %v292_v11, 16  ;;  %vm295_vm4 = vcmp.lt.s32.totalorder %v292_v11, 15  ;;  %p600_p4 = pnand %p599_p2, %p593_p7 }
  0x5e   : > { %212 = vrot.lane.b32.xlu1 %v863_v6, %s664_s5  ;;  %210 = vrot.lane.b32.xlu0 %v865_v7, %s664_s5  ;;  %v287_v37 = vadd.f32 %v286_v34, %v283_v35  ;;  %vm302_vm3 = vmand %vm299_vm1, %vm300_vm2 }
  0x5f   : > { %v288_v38 = vmul.f32 0.33333334, %v285_v36 }
  0x60   : > { %v289_v39 = vmul.f32 0.33333334, %v287_v37 }
  0x61   : > { %v313_v40 = vsub.f32 0.0, %v288_v38 }
  0x62   : > { %v314_v41 = vsub.f32 0.0, %v289_v39 }
  0x63   : > { %v315_v42 = vmul.f32 1.442695, %v313_v40 }
  0x64   : > { %v317_v43 = vmul.f32 1.442695, %v314_v41 }
  0x65   : > { %526 = vpow2.f32 %v315_v42 }
  0x66   : > { %528 = vpow2.f32 %v317_v43 }
  0x72   : > { %v527_v14 = vpop.eup %526 }
  0x73   : > { %v529_v17 = vpop.eup %528 }
  0x74   : > { %v320_v22 = vmul.f32 %v529_v17, %v228_v16 }
  0x76   : > { %v322_v26 = vsel %vm302_vm3, %v320_v22, 0.0 }
  0xc4   : > { %v234_v44 = vpop.permute.xlu1 %233  ;;  %v230_v45 = vpop.permute.xlu0 %229 }
  0xc5   : > { %v243_v48 = vsub.f32 %v845_v0, %v234_v44  ;;  %v241_v49 = vsub.f32 %v847_v1, %v230_v45 }
  0xc7   : > { %v249_v56 = vand.u32 2147483647, %v243_v48  ;;  %v247_v57 = vand.u32 2147483647, %v241_v49 }
  0xc8   : > { %v236_v50 = vpop.permute.xlu1 %235  ;;  %v232_v51 = vpop.permute.xlu0 %231 }
  0xc9   : > { %v244_v54 = vsub.f32 %v851_v2, %v236_v50  ;;  %v242_v55 = vsub.f32 %v853_v3, %v232_v51  ;;  %v253_v2 = vadd.f32 %v249_v56, %v247_v57 }
  0xcb   : > { %v250_v58 = vand.u32 2147483647, %v244_v54  ;;  %v248_v59 = vand.u32 2147483647, %v242_v55 }
  0xcc   : > { %v240_v62 = vpop.permute.xlu1 %239  ;;  %v238_v63 = vpop.permute.xlu0 %237 }
  0xcd   : > { %v246_v0 = vsub.f32 %v857_v4, %v240_v62  ;;  %v245_v1 = vsub.f32 %v859_v5, %v238_v63  ;;  %v255_v12 = vadd.f32 %v250_v58, %v248_v59  ;;  %v319_v4 = vmul.f32 %v527_v14, %v227_v15 }
  0xcf   : > { %v252_v3 = vand.u32 2147483647, %v246_v0  ;;  %v251_v13 = vand.u32 2147483647, %v245_v1  ;;  %v321_v25 = vsel %vm300_vm2, %v319_v4, 0.0 }
  0xd0   : > { %v334_v27 = vadd.f32 %v322_v26, %v321_v25  ;;  %v213_v28 = vpop.permute.xlu1 %212  ;;  %v211_v29 = vpop.permute.xlu0 %210 }
  0xd1   : > { %v256_v18 = vadd.f32 %v255_v12, %v252_v3  ;;  %v254_v19 = vadd.f32 %v253_v2, %v251_v13  ;;  %v215_v30 = vsub.f32 %v863_v6, %v213_v28  ;;  %v214_v32 = vsub.f32 %v865_v7, %v211_v29 }
  0xd2   : > { %v335_v31 = vrot.slane %v334_v27, 4 }
  0xd3   : > { %v259_v20 = vmul.f32 0.33333334, %v256_v18  ;;  %v258_v21 = vmul.f32 0.33333334, %v254_v19  ;;  %v217_v33 = vand.u32 2147483647, %v215_v30 }
  0xd4   : > { %v336_v34 = vadd.f32 %v335_v31, %v334_v27  ;;  %v216_v35 = vand.u32 2147483647, %v214_v32 }
  0xd5   : > { %v304_v5 = vsub.f32 0.0, %v259_v20  ;;  %v303_v23 = vsub.f32 0.0, %v258_v21 }
  0xd6   : > { %v337_v39 = vrot.slane %v336_v34, 2 }
  0xd7   : > { %v307_v8 = vmul.f32 1.442695, %v304_v5  ;;  %v305_v24 = vmul.f32 1.442695, %v303_v23 }
  0xd8   : > { %v338_v44 = vadd.f32 %v337_v39, %v336_v34 }
  0xd9   : > { %530 = vpow2.f32 %v307_v8 }
  0xda   : > { %532 = vpow2.f32 %v305_v24  ;;  %v339_v46 = vrot.slane %v338_v44, 1 }
  0xdc   : > { %v340_v48 = vadd.f32 %v339_v46, %v338_v44 }
  0xde   : > { %v342_v51 = vmul.f32 0.0020833334, %v340_v48 }
  0xe6   : > { %v531_v36 = vpop.eup %530 }
  0xe7   : > { %v533_v37 = vpop.eup %532  ;;  %v310_v38 = vmul.f32 %v531_v36, %v217_v33 }
  0xe8   : > { %v309_v40 = vmul.f32 %v533_v37, %v216_v35 }
  0xe9   : > { %v312_v41 = vsel %vm295_vm4, %v310_v38, 0.0 }
  0xea   : > { %v311_v42 = vsel %vm295_vm4, %v309_v40, 0.0 }
  0xeb   : > { %v325_v43 = vadd.f32 %v312_v41, %v311_v42 }
  0xed   : > { %v326_v45 = vrot.slane %v325_v43, 4 }
  0xef   : > { %v327_v6 = vadd.f32 %v326_v45, %v325_v43 }
  0xf1   : > { %v328_v47 = vrot.slane %v327_v6, 2 }
  0xf3   : > { %v329_v7 = vadd.f32 %v328_v47, %v327_v6 }
  0xf5   : > { %v330_v49 = vrot.slane %v329_v7, 1 }
  0xf7   : > { %v331_v50 = vadd.f32 %v330_v49, %v329_v7 }
  0xf9   : > { %v341_v52 = vmul.f32 0.0020833334, %v331_v50 }
  0xfb   : > { %v343_v53 = vadd.f32 %v342_v51, %v341_v52 }
  0xfd   : > { %v345_v54 = vsel %vm344_vm5, %v343_v53, 0.0 }
  0xfe   : > { %346 = vst [vmem:[%s201_s17] sm:$0xff] %v345_v54 }
  0xff   : > { %603 = shalt.err (!%p600_p4)
}
 0x100   : > { %s604_s30 = scalar_lea.hbm %s919_s6, 128  ;;  %s608_s19 = scalar_lea.hbm %s958_s2, 256 }
 0x101   : > { %p605_p9 = scmp.ne.s32.totalorder %s919_s6, %s604_s30  ;;  %p609_p5 = scmp.lt.s32.totalorder %s919_s6, %s958_s2 }
 0x102   : > { %p610_p8 = scmp.lt.s32.totalorder %s608_s19, %s604_s30 }
 0x103   : > { %p606_p11 = pnand %p605_p9, %p968_p1 }
 0x104   : > { %p611_p6 = por %p610_p8, %p609_p5 }
 0x105   : > { %p607_p3 = pneg %p606_p11 }
 0x107   : > { %p612_p13 = pnand %p611_p6, %p607_p3 }
 0x109   : > { %615 = shalt.err (!%p612_p13)
}
 0x10a   : > { %476 = dma.vmem_to_hbm [thread:$0]  (%p968_p1), %s362_s28, 128, %s919_s6, %s348_s23  }
 0x10b PF: > { %s373_s27 = sand.u32 1, %s646_s9   ;;  %p969_p12 = scmp.ne.s32.totalorder %s964_s22, 0 }
 0x10c   : > { %p970_p7 = scmp.ge.s32.totalorder %s658_s12, 2  ;;  %s374_s5 = scalar_lea.sflag [#allocation4], %s373_s27 }
 0x10e   : > { %p486_p10 = pnand %p970_p7, %p969_p12 }
 0x110   : > { %p487_p0 = pneg %p486_p10 }
 0x112   : > { %641 = dma.done.wait (%p487_p0), %s374_s5, 128  }
 0x113   : > { %643 = vsyncadd (%p487_p0), %s374_s5, 4294967168  ;;  %p18_p2 = scmp.ge.s32.totalorder %s706_s15, 4   ;;  %s971_s9 = smov %s650_s10 }
 0x114   : > { %s972_s10 = smov %s654_s11  ;;  %s973_s11 = smov %s718_s18 }
 0x115   : > { %s974_s12 = smov %s706_s15  ;;  %20 = sbr.rel (!%p18_p2) target bundleno = 7 (0x7), region = 86 }
 0x11a   :  { %379 = vsyncpa [#allocation3], 1 }
 0x11b   :  { %381 = vsyncpa [#allocation3 + $0x1], 1 }
 0x11c   :  { %382 = vsyncpa [#allocation6], 1 }
 0x11d   :  { %384 = vsyncpa [#allocation6 + $0x1], 1 }
 0x11e   :  { %385 = vsyncpa [#allocation4], 1 }
 0x11f   :  { %387 = vsyncpa [#allocation4 + $0x1], 1 }

</bundles_post_ra>
